<compile_context>
chip_gen: v7x
topology: tpu7x:2x2x1
jax: 0.10.0
libtpu: 0.0.40
codegen_flags: <defaults>
</compile_context>

<pallas_src>
import functools

import jax
import jax.numpy as jnp
from jax.experimental import pallas as pl
from jax.experimental.pallas import tpu as pltpu


LANE = 128


def _round_up(x, m):
    return ((x + m - 1) // m) * m


def _mlp_kernel_with_hidden(x_ref, w1_ref, b1_ref, w2_ref, b2_ref,
                            out_ref, hid_ref, acc_ref):
    k = pl.program_id(1)

    @pl.when(k == 0)
    def _init():
        acc_ref[...] = jnp.zeros_like(acc_ref)

    # Accumulate fc = x @ W1 over the K (F_in) grid axis.
    acc_ref[...] += jnp.dot(x_ref[...], w1_ref[...],
                            preferred_element_type=jnp.float32)

    @pl.when(k == pl.num_programs(1) - 1)
    def _finalize():
        # Bias + ReLU applied once per output tile (not per K step).
        a = jnp.maximum(acc_ref[...] + b1_ref[...], 0.0)
        hid_ref[...] = a.astype(hid_ref.dtype)
        # Dropout (eval mode) -> identity.
        out = jnp.dot(a.astype(w2_ref.dtype), w2_ref[...],
                      preferred_element_type=jnp.float32)
        out_ref[...] = (out + b2_ref[...]).astype(out_ref.dtype)


def _mlp_kernel_no_hidden(x_ref, w1_ref, b1_ref, w2_ref, b2_ref,
                          out_ref, acc_ref):
    k = pl.program_id(1)

    @pl.when(k == 0)
    def _init():
        acc_ref[...] = jnp.zeros_like(acc_ref)

    acc_ref[...] += jnp.dot(x_ref[...], w1_ref[...],
                            preferred_element_type=jnp.float32)

    @pl.when(k == pl.num_programs(1) - 1)
    def _finalize():
        a = jnp.maximum(acc_ref[...] + b1_ref[...], 0.0)
        # Dropout (eval mode) -> identity; hidden never written back to HBM.
        out = jnp.dot(a.astype(w2_ref.dtype), w2_ref[...],
                      preferred_element_type=jnp.float32)
        out_ref[...] = (out + b2_ref[...]).astype(out_ref.dtype)


@functools.partial(jax.jit, static_argnames=("return_hidden",))
def baseline_forward(x, w1, b1, w2, b2, *, return_hidden):
    """x: [B, F_in]; w1: [F_in, H]; b1: [H]; w2: [H, F_out]; b2: [F_out]."""
    if return_hidden not in (0, 1):
        raise ValueError("return_hidden must be 0 or 1")

    B, F_in = x.shape
    H = w1.shape[1]
    F_out = w2.shape[1]

    # ---- lane/sublane-friendly padded sizes --------------------------------
    F_in_p = _round_up(F_in, LANE)
    H_p = _round_up(H, LANE)
    F_out_p = _round_up(F_out, LANE)

    # Batch tile: multiple of 8 (f32 sublane), capped at 128 rows per step.
    TM = min(128, _round_up(B, 8))
    B_p = _round_up(B, TM)

    # K tile: largest of these that divides the 128-padded F_in.
    TK = F_in_p
    for cand in (512, 384, 256, 128):
        if F_in_p >= cand and F_in_p % cand == 0:
            TK = cand
            break

    # Zero-padding is exact: padded rows/cols contribute 0 to the matmuls and
    # relu(0 + 0) @ 0 == 0, and are sliced off below.
    xp = jnp.zeros((B_p, F_in_p), x.dtype).at[:B, :F_in].set(x)
    w1p = jnp.zeros((F_in_p, H_p), w1.dtype).at[:F_in, :H].set(w1)
    b1p = jnp.zeros((1, H_p), b1.dtype).at[0, :H].set(b1)
    w2p = jnp.zeros((H_p, F_out_p), w2.dtype).at[:H, :F_out].set(w2)
    b2p = jnp.zeros((1, F_out_p), b2.dtype).at[0, :F_out].set(b2)

    grid = (B_p // TM, F_in_p // TK)

    in_specs = [
        pl.BlockSpec((TM, TK), lambda i, k: (i, k)),        # x tile
        pl.BlockSpec((TK, H_p), lambda i, k: (k, 0)),       # W1 tile
        pl.BlockSpec((1, H_p), lambda i, k: (0, 0)),        # b1
        pl.BlockSpec((H_p, F_out_p), lambda i, k: (0, 0)),  # W2 (full)
        pl.BlockSpec((1, F_out_p), lambda i, k: (0, 0)),    # b2
    ]
    out_spec_out = pl.BlockSpec((TM, F_out_p), lambda i, k: (i, 0))
    out_spec_hid = pl.BlockSpec((TM, H_p), lambda i, k: (i, 0))

    flops = 2 * B_p * (F_in_p * H_p + H_p * F_out_p)
    bytes_accessed = 4 * (
        B_p * F_in_p + F_in_p * H_p + H_p + H_p * F_out_p + F_out_p
        + B_p * F_out_p + (B_p * H_p if return_hidden == 1 else 0)
    )
    cost = pl.CostEstimate(flops=flops, transcendentals=0,
                           bytes_accessed=bytes_accessed)

    compiler_params = pltpu.CompilerParams(
        # M axis parallel (shards across v7x's 2 TCs), K reduction arbitrary.
        dimension_semantics=("parallel", "arbitrary"),
        # Budget for v7x (64 MiB physical / 32 MiB scoped default).
        vmem_limit_bytes=32 * 1024 * 1024,
    )

    scratch_shapes = [pltpu.VMEM((TM, H_p), jnp.float32)]

    if return_hidden == 1:
        out_p, hid_p = pl.pallas_call(
            _mlp_kernel_with_hidden,
            out_shape=(
                jax.ShapeDtypeStruct((B_p, F_out_p), jnp.float32),
                jax.ShapeDtypeStruct((B_p, H_p), jnp.float32),
            ),
            grid_spec=pltpu.PrefetchScalarGridSpec(
                num_scalar_prefetch=0,
                grid=grid,
                in_specs=in_specs,
                out_specs=[out_spec_out, out_spec_hid],
                scratch_shapes=scratch_shapes,
            ),
            compiler_params=compiler_params,
            cost_estimate=cost,
        )(xp, w1p, b1p, w2p, b2p)
        return out_p[:B, :F_out], hid_p[:B, :H]
    else:
        out_p = pl.pallas_call(
            _mlp_kernel_no_hidden,
            out_shape=jax.ShapeDtypeStruct((B_p, F_out_p), jnp.float32),
            grid_spec=pltpu.PrefetchScalarGridSpec(
                num_scalar_prefetch=0,
                grid=grid,
                in_specs=in_specs,
                out_specs=out_spec_out,
                scratch_shapes=scratch_shapes,
            ),
            compiler_params=compiler_params,
            cost_estimate=cost,
        )(xp, w1p, b1p, w2p, b2p)
        return out_p[:B, :F_out]


def init_params(key, input_features, hidden_sizes, output_features):
    """Deterministic init mimicking PyTorch Linear default (U[-1/sqrt(fan_in), ...])."""
    k1, k2, k3, k4 = jax.random.split(key, 4)
    bound1 = 1.0 / (input_features ** 0.5)
    bound2 = 1.0 / (hidden_sizes ** 0.5)
    # Stored pre-transposed: [in, out].
    w1 = jax.random.uniform(k1, (input_features, hidden_sizes), jnp.float32,
                            -bound1, bound1)
    b1 = jax.random.uniform(k2, (hidden_sizes,), jnp.float32, -bound1, bound1)
    w2 = jax.random.uniform(k3, (hidden_sizes, output_features), jnp.float32,
                            -bound2, bound2)
    b2 = jax.random.uniform(k4, (output_features,), jnp.float32, -bound2, bound2)
    return w1, b1, w2, b2


def _reference(x, w1, b1, w2, b2):
    a = jnp.maximum(x @ w1 + b1, 0.0)
    return a @ w2 + b2, a


if __name__ == "__main__":
    key = jax.random.PRNGKey(0)

    # ---- small shapes matching the module's spirit -------------------------
    k_x, k_p = jax.random.split(key)
    B, input_features, hidden_sizes, output_features = 8, 16, 32, 8
    dropout = 0.5  # eval mode -> no-op

    x = jax.random.normal(k_x, (B, input_features), jnp.float32)
    w1, b1, w2, b2 = init_params(k_p, input_features, hidden_sizes, output_features)

    out, hidden = baseline_forward(x, w1, b1, w2, b2, return_hidden=1)
    out = jax.block_until_ready(out)
    hidden = jax.block_until_ready(hidden)
    out_only = jax.block_until_ready(
        baseline_forward(x, w1, b1, w2, b2, return_hidden=0))

    out_ref, a_ref = _reference(x, w1, b1, w2, b2)
    assert out.shape == (B, output_features)
    assert hidden.shape == (B, hidden_sizes)
    assert jnp.allclose(out, out_ref, atol=1e-5), "output mismatch (small)"
    assert jnp.allclose(hidden, a_ref, atol=1e-5), "hidden mismatch (small)"
    assert jnp.allclose(out_only, out_ref, atol=1e-5), "output-only mismatch (small)"

    # ---- larger shapes to exercise the tiled (M, K) grid + accumulator -----
    k_x2, k_p2 = jax.random.split(jax.random.PRNGKey(1))
    B2, in2, hid2, out2 = 256, 384, 96, 10
    x2 = jax.random.normal(k_x2, (B2, in2), jnp.float32)
    p2 = init_params(k_p2, in2, hid2, out2)

    o2, h2 = baseline_forward(x2, *p2, return_hidden=1)
    o2 = jax.block_until_ready(o2)
    h2 = jax.block_until_ready(h2)
    o2_ref, h2_ref = _reference(x2, *p2)
    assert jnp.allclose(o2, o2_ref, atol=1e-4), "output mismatch (tiled)"
    assert jnp.allclose(h2, h2_ref, atol=1e-4), "hidden mismatch (tiled)"

    o2_only = jax.block_until_ready(baseline_forward(x2, *p2, return_hidden=0))
    assert jnp.allclose(o2_only, o2_ref, atol=1e-4), "output-only mismatch (tiled)"

    print("KERNEL_OK")
</pallas_src>

<mosaic_0001>
module attributes {stable_mosaic.version = 11 : i64} {
  func.func @_mlp_kernel_with_hidden(%arg0: i32, %arg1: i32, %arg2: memref<8x128xf32, #tpu.memory_space<vmem>>, %arg3: memref<128x128xf32, #tpu.memory_space<vmem>>, %arg4: memref<1x128xf32, #tpu.memory_space<vmem>>, %arg5: memref<128x128xf32, #tpu.memory_space<vmem>>, %arg6: memref<1x128xf32, #tpu.memory_space<vmem>>, %arg7: memref<8x128xf32, #tpu.memory_space<vmem>>, %arg8: memref<8x128xf32, #tpu.memory_space<vmem>>, %arg9: memref<8x128xf32, #tpu.memory_space<vmem>>) attributes {dimension_semantics = [#tpu.dimension_semantics<parallel>, #tpu.dimension_semantics<arbitrary>], iteration_bounds = array<i64: 1, 1>, scalar_prefetch = 0 : i64, scratch_operands = 1 : i64, tpu.core_type = #tpu.core_type<tc>, window_params = [{transform_indices = @transform_0, window_bounds = array<i64: 8, 128>}, {transform_indices = @transform_1, window_bounds = array<i64: 128, 128>}, {pipeline_mode = #tpu.pipeline_mode<synchronous>, transform_indices = @transform_2, window_bounds = array<i64: 1, 128>}, {pipeline_mode = #tpu.pipeline_mode<synchronous>, transform_indices = @transform_3, window_bounds = array<i64: 128, 128>}, {pipeline_mode = #tpu.pipeline_mode<synchronous>, transform_indices = @transform_4, window_bounds = array<i64: 1, 128>}, {transform_indices = @transform_5, window_bounds = array<i64: 8, 128>}, {transform_indices = @transform_6, window_bounds = array<i64: 8, 128>}]} {
    %c0_i32 = arith.constant 0 : i32
    %0 = arith.cmpi eq, %arg1, %c0_i32 : i32
    %1 = arith.extui %0 : i1 to i32
    %c0_i32_0 = arith.constant 0 : i32
    %2 = arith.cmpi ne, %1, %c0_i32_0 : i32
    scf.if %2 {
      %cst_10 = arith.constant 0.000000e+00 : f32
      %12 = vector.broadcast %cst_10 : f32 to vector<8x128xf32>
      %c0_11 = arith.constant 0 : index
      %c0_12 = arith.constant 0 : index
      %13 = vector.load %arg9[%c0_11, %c0_12] : memref<8x128xf32, #tpu.memory_space<vmem>>, vector<8x128xf32>
      tpu.vector_store %arg9[%c0_11, %c0_12], %12 {strides = array<i32>} : memref<8x128xf32, #tpu.memory_space<vmem>>, vector<8x128xf32>,
    } else {
    }
    %c0 = arith.constant 0 : index
    %c0_1 = arith.constant 0 : index
    %3 = vector.load %arg9[%c0, %c0_1] : memref<8x128xf32, #tpu.memory_space<vmem>>, vector<8x128xf32>
    %c0_2 = arith.constant 0 : index
    %c0_3 = arith.constant 0 : index
    %4 = vector.load %arg2[%c0_2, %c0_3] : memref<8x128xf32, #tpu.memory_space<vmem>>, vector<8x128xf32>
    %c0_4 = arith.constant 0 : index
    %c0_5 = arith.constant 0 : index
    %5 = vector.load %arg3[%c0_4, %c0_5] : memref<128x128xf32, #tpu.memory_space<vmem>>, vector<128x128xf32>
    %cst = arith.constant dense<0.000000e+00> : vector<8x128xf32>
    %6 = tpu.matmul %4, %5, %cst {dimension_numbers = #tpu.dot_dimension_numbers<[1], [0], [0], [1], [0, 0, 1, 1], [], []>} : vector<8x128xf32>, vector<128x128xf32>, vector<8x128xf32> -> vector<8x128xf32>
    %7 = arith.addf %3, %6 : vector<8x128xf32>
    %c0_6 = arith.constant 0 : index
    %c0_7 = arith.constant 0 : index
    %8 = vector.load %arg9[%c0_6, %c0_7] : memref<8x128xf32, #tpu.memory_space<vmem>>, vector<8x128xf32>
    tpu.vector_store %arg9[%c0_6, %c0_7], %7 {strides = array<i32>} : memref<8x128xf32, #tpu.memory_space<vmem>>, vector<8x128xf32>,
    %c0_i32_8 = arith.constant 0 : i32
    %9 = arith.cmpi eq, %arg1, %c0_i32_8 : i32
    %10 = arith.extui %9 : i1 to i32
    %c0_i32_9 = arith.constant 0 : i32
    %11 = arith.cmpi ne, %10, %c0_i32_9 : i32
    scf.if %11 {
      %c0_10 = arith.constant 0 : index
      %c0_11 = arith.constant 0 : index
      %12 = vector.load %arg9[%c0_10, %c0_11] : memref<8x128xf32, #tpu.memory_space<vmem>>, vector<8x128xf32>
      %c0_12 = arith.constant 0 : index
      %c0_13 = arith.constant 0 : index
      %13 = vector.load %arg4[%c0_12, %c0_13] : memref<1x128xf32, #tpu.memory_space<vmem>>, vector<1x128xf32>
      %14 = vector.broadcast %13 : vector<1x128xf32> to vector<8x128xf32>
      %15 = arith.addf %12, %14 : vector<8x128xf32>
      %cst_14 = arith.constant 0.000000e+00 : f32
      %16 = vector.broadcast %cst_14 : f32 to vector<8x128xf32>
      %17 = arith.maximumf %15, %16 : vector<8x128xf32>
      %c0_15 = arith.constant 0 : index
      %c0_16 = arith.constant 0 : index
      %18 = vector.load %arg8[%c0_15, %c0_16] : memref<8x128xf32, #tpu.memory_space<vmem>>, vector<8x128xf32>
      tpu.vector_store %arg8[%c0_15, %c0_16], %17 {strides = array<i32>} : memref<8x128xf32, #tpu.memory_space<vmem>>, vector<8x128xf32>,
      %c0_17 = arith.constant 0 : index
      %c0_18 = arith.constant 0 : index
      %19 = vector.load %arg5[%c0_17, %c0_18] : memref<128x128xf32, #tpu.memory_space<vmem>>, vector<128x128xf32>
      %cst_19 = arith.constant dense<0.000000e+00> : vector<8x128xf32>
      %20 = tpu.matmul %17, %19, %cst_19 {dimension_numbers = #tpu.dot_dimension_numbers<[1], [0], [0], [1], [0, 0, 1, 1], [], []>} : vector<8x128xf32>, vector<128x128xf32>, vector<8x128xf32> -> vector<8x128xf32>
      %c0_20 = arith.constant 0 : index
      %c0_21 = arith.constant 0 : index
      %21 = vector.load %arg6[%c0_20, %c0_21] : memref<1x128xf32, #tpu.memory_space<vmem>>, vector<1x128xf32>
      %22 = vector.broadcast %21 : vector<1x128xf32> to vector<8x128xf32>
      %23 = arith.addf %20, %22 : vector<8x128xf32>
      %c0_22 = arith.constant 0 : index
      %c0_23 = arith.constant 0 : index
      %24 = vector.load %arg7[%c0_22, %c0_23] : memref<8x128xf32, #tpu.memory_space<vmem>>, vector<8x128xf32>
      tpu.vector_store %arg7[%c0_22, %c0_23], %23 {strides = array<i32>} : memref<8x128xf32, #tpu.memory_space<vmem>>, vector<8x128xf32>,
    } else {
    }
    return
  }
  func.func @transform_0(%arg0: i32, %arg1: i32) -> (i32, i32) {
    %c0_i32 = arith.constant 0 : i32
    return %arg0, %arg1 : i32, i32
  }
  func.func @transform_1(%arg0: i32, %arg1: i32) -> (i32, i32) {
    %c0_i32 = arith.constant 0 : i32
    %c0_i32_0 = arith.constant 0 : i32
    return %arg1, %c0_i32 : i32, i32
  }
  func.func @transform_2(%arg0: i32, %arg1: i32) -> (i32, i32) {
    %c0_i32 = arith.constant 0 : i32
    %c0_i32_0 = arith.constant 0 : i32
    %c0_i32_1 = arith.constant 0 : i32
    return %c0_i32, %c0_i32_0 : i32, i32
  }
  func.func @transform_3(%arg0: i32, %arg1: i32) -> (i32, i32) {
    %c0_i32 = arith.constant 0 : i32
    %c0_i32_0 = arith.constant 0 : i32
    %c0_i32_1 = arith.constant 0 : i32
    return %c0_i32, %c0_i32_0 : i32, i32
  }
  func.func @transform_4(%arg0: i32, %arg1: i32) -> (i32, i32) {
    %c0_i32 = arith.constant 0 : i32
    %c0_i32_0 = arith.constant 0 : i32
    %c0_i32_1 = arith.constant 0 : i32
    return %c0_i32, %c0_i32_0 : i32, i32
  }
  func.func @transform_5(%arg0: i32, %arg1: i32) -> (i32, i32) {
    %c0_i32 = arith.constant 0 : i32
    %c0_i32_0 = arith.constant 0 : i32
    return %arg0, %c0_i32 : i32, i32
  }
  func.func @transform_6(%arg0: i32, %arg1: i32) -> (i32, i32) {
    %c0_i32 = arith.constant 0 : i32
    %c0_i32_0 = arith.constant 0 : i32
    return %arg0, %c0_i32 : i32, i32
  }
}

</mosaic_0001>

<bundles_post_ra>
// kernel: baseline_forward.1
= control target key start
LH: loop header
LB: loop body
LE: loop exit
PB: predicated region body
PF: predicated region fallthrough
CT: control target
= control target key end

     0   :  { %12 = vsyncpa [#allocation4], 0  ;;  %v462_v3 = vmov 0.0|0.0   ;;  %vm463_vm0 = vmmov 0   ;;  %v464_v6 = vmov 0.0   ;;  %s647_s0 = inlined_call_operand.vmem [shape: f32[8,128], index: 0, kind: input, shape index: {}]   ;;  %s648_s1 = inlined_call_operand.vmem [shape: f32[128,128], index: 1, kind: input, shape index: {}]   ;;  %s649_s2 = inlined_call_operand.vmem [shape: f32[1,128], index: 2, kind: input, shape index: {}]   ;;  %s650_s3 = inlined_call_operand.vmem [shape: f32[128,128], index: 3, kind: input, shape index: {}]   ;;  %s651_s4 = inlined_call_operand.vmem [shape: f32[1,128], index: 4, kind: input, shape index: {}]   ;;  %s652_s5 = inlined_call_operand.hbm [shape: f32[8,128], index: 5, kind: output, shape index: {0}]   ;;  %s653_s6 = inlined_call_operand.hbm [shape: f32[8,128], index: 6, kind: output, shape index: {1}]  }
   0x1   :  { %v31_v0 = vld [vmem:[%s648_s1] sm:$0xff]  ;;  %v32_v1 = vld [vmem:[%s648_s1 + $0x8] sm:$0xff]  ;;  %v33_v2 = vld [vmem:[%s648_s1 + $0x10] sm:$0xff]  ;;  %361 = vmatprep.subr.bf16.mxu0 %v462_v3  ;;  %323 = vmatprep.mubr.msk.f32.mxu0 %vm463_vm0, %v464_v6 }
   0x2   :  { %v362_v4 = vpack.c.bf16 %v32_v1, %v31_v0  ;;  %v34_v5 = vld [vmem:[%s648_s1 + $0x18] sm:$0xff]  ;;  %385 = vmatprep.subr.bf16.mxu1 %v462_v3  ;;  %358 = vmatprep.mubr.msk.f32.mxu1 %vm463_vm0, %v464_v6  ;;  %v35_v8 = vld [vmem:[%s648_s1 + $0x20] sm:$0xff]  ;;  %v36_v9 = vld [vmem:[%s648_s1 + $0x28] sm:$0xff] }
   0x3   :  { %v365_v7 = vpack.c.bf16 %v34_v5, %v33_v2  ;;  %v133_v10 = vld [vmem:[%s650_s3] sm:$0xff]  ;;  %v134_v11 = vld [vmem:[%s650_s3 + $0x8] sm:$0xff]  ;;  %v135_v12 = vld [vmem:[%s650_s3 + $0x10] sm:$0xff]  ;;  %v368_v14 = vpack.c.bf16 %v36_v9, %v35_v8 }
   0x4   :  { %363 = vmatpush3.bf16.msra.mxu0 %v362_v4  ;;  %v136_v13 = vld [vmem:[%s650_s3 + $0x18] sm:$0xff]  ;;  %v386_v15 = vpack.c.bf16 %v134_v11, %v133_v10  ;;  %v37_v16 = vld [vmem:[%s648_s1 + $0x30] sm:$0xff]  ;;  %v137_v19 = vld [vmem:[%s650_s3 + $0x20] sm:$0xff] }
   0x5   :  { %364 = vmatprep.subr.bf16.mxu0 %v462_v3  ;;  %v38_v17 = vld [vmem:[%s648_s1 + $0x38] sm:$0xff]  ;;  %v389_v18 = vpack.c.bf16 %v136_v13, %v135_v12  ;;  %v138_v20 = vld [vmem:[%s650_s3 + $0x28] sm:$0xff] }
   0x6   :  { %387 = vmatpush3.bf16.msra.mxu1 %v386_v15 }
   0x7   :  { %388 = vmatprep.subr.bf16.mxu1 %v462_v3 }
   0x8   :  { %366 = vmatpush3.bf16.msra.mxu0 %v365_v7 }
   0x9   :  { %367 = vmatprep.subr.bf16.mxu0 %v462_v3 }
   0xa   :  { %13 = vsyncpa [#allocation6], 0  ;;  %v371_v21 = vpack.c.bf16 %v38_v17, %v37_v16  ;;  %v39_v22 = vld [vmem:[%s648_s1 + $0x40] sm:$0xff]  ;;  %v40_v23 = vld [vmem:[%s648_s1 + $0x48] sm:$0xff]  ;;  %390 = vmatpush3.bf16.msra.mxu1 %v389_v18  ;;  %v392_v24 = vpack.c.bf16 %v138_v20, %v137_v19 }
   0xb   :  { %391 = vmatprep.subr.bf16.mxu1 %v462_v3  ;;  %v139_v25 = vld [vmem:[%s650_s3 + $0x30] sm:$0xff]  ;;  %v140_v26 = vld [vmem:[%s650_s3 + $0x38] sm:$0xff]  ;;  %v374_v27 = vpack.c.bf16 %v40_v23, %v39_v22  ;;  %v141_v31 = vld [vmem:[%s650_s3 + $0x40] sm:$0xff] }
   0xc   :  { %369 = vmatpush3.bf16.msra.mxu0 %v368_v14  ;;  %v41_v28 = vld [vmem:[%s648_s1 + $0x50] sm:$0xff]  ;;  %v42_v29 = vld [vmem:[%s648_s1 + $0x58] sm:$0xff]  ;;  %v395_v30 = vpack.c.bf16 %v140_v26, %v139_v25  ;;  %v142_v32 = vld [vmem:[%s650_s3 + $0x48] sm:$0xff] }
   0xd   :  { %370 = vmatprep.subr.bf16.mxu0 %v462_v3  ;;  %v377_v33 = vpack.c.bf16 %v42_v29, %v41_v28  ;;  %v43_v34 = vld [vmem:[%s648_s1 + $0x60] sm:$0xff]  ;;  %v44_v35 = vld [vmem:[%s648_s1 + $0x68] sm:$0xff]  ;;  %v398_v36 = vpack.c.bf16 %v142_v32, %v141_v31  ;;  %v143_v37 = vld [vmem:[%s650_s3 + $0x50] sm:$0xff] }
   0xe   :  { %393 = vmatpush3.bf16.msra.mxu1 %v392_v24  ;;  %v144_v38 = vld [vmem:[%s650_s3 + $0x58] sm:$0xff]  ;;  %v380_v39 = vpack.c.bf16 %v44_v35, %v43_v34  ;;  %v45_v40 = vld [vmem:[%s648_s1 + $0x70] sm:$0xff]  ;;  %v145_v43 = vld [vmem:[%s650_s3 + $0x60] sm:$0xff] }
   0xf   :  { %394 = vmatprep.subr.bf16.mxu1 %v462_v3  ;;  %v46_v41 = vld [vmem:[%s648_s1 + $0x78] sm:$0xff]  ;;  %v401_v42 = vpack.c.bf16 %v144_v38, %v143_v37  ;;  %v146_v44 = vld [vmem:[%s650_s3 + $0x68] sm:$0xff]  ;;  %v30_v47 = vld [vmem:[%s647_s0] sm:$0xff]  ;;  %s465_s0 = smov [#allocation5]  }
  0x10   :  { %372 = vmatpush3.bf16.msra.mxu0 %v371_v21  ;;  %v383_v45 = vpack.c.bf16 %v46_v41, %v45_v40  ;;  %v404_v46 = vpack.c.bf16 %v146_v44, %v145_v43  ;;  %v147_v48 = vld [vmem:[%s650_s3 + $0x70] sm:$0xff]  ;;  %v148_v49 = vld [vmem:[%s650_s3 + $0x78] sm:$0xff]  ;;  %v255_v51 = vld [vmem:[%s649_s2] ss:$0 sm:$0xff]  ;;  %s243_s16 = sshll.u32 %s465_s0, 4  ;;  %s244_s16 = int_to_ptr.vmem [resolvable:$true] %s243_s16 }
  0x11   :  { %373 = vmatprep.subr.bf16.mxu0 %v462_v3  ;;  %v407_v50 = vpack.c.bf16 %v148_v49, %v147_v48  ;;  %s414_s17 = scalar_lea.vmem %s244_s16, 128  ;;  %p419_p1 = scmp.lt.s32.totalorder %s244_s16, %s244_s16 }
  0x12   :  { %396 = vmatpush3.bf16.msra.mxu1 %v395_v30  ;;  %p415_p0 = scmp.ne.s32.totalorder %s244_s16, %s414_s17  ;;  %p420_p2 = scmp.lt.s32.totalorder %s414_s17, %s414_s17 }
  0x13   :  { %397 = vmatprep.subr.bf16.mxu1 %v462_v3 }
  0x14   :  { %375 = vmatpush3.bf16.msra.mxu0 %v374_v27  ;;  %p421_p3 = por %p420_p2, %p419_p1 }
  0x15   :  { %376 = vmatprep.subr.bf16.mxu0 %v462_v3 }
  0x16   :  { %399 = vmatpush3.bf16.msra.mxu1 %v398_v36  ;;  %p422_p4 = pnand %p421_p3, %p415_p0 }
  0x17   :  { %400 = vmatprep.subr.bf16.mxu1 %v462_v3 }
  0x18   :  { %378 = vmatpush3.bf16.msra.mxu0 %v377_v33 }
  0x19   :  { %379 = vmatprep.subr.bf16.mxu0 %v462_v3 }
  0x1a   :  { %402 = vmatpush3.bf16.msra.mxu1 %v401_v42 }
  0x1b   :  { %403 = vmatprep.subr.bf16.mxu1 %v462_v3 }
  0x1c   :  { %381 = vmatpush3.bf16.msra.mxu0 %v380_v39 }
  0x1d   :  { %382 = vmatprep.subr.bf16.mxu0 %v462_v3 }
  0x1e   :  { %405 = vmatpush3.bf16.msra.mxu1 %v404_v46 }
  0x1f   :  { %406 = vmatprep.subr.bf16.mxu1 %v462_v3 }
  0x20   :  { %384 = vmatpush3.bf16.msra.mxu0 %v383_v45 }
  0x22   :  { %408 = vmatpush3.bf16.msra.mxu1 %v407_v50 }
  0x23   :  { %324 = vmatmul.mubr.f32.vlgmr.msra.gmra.mrb[0].mxu0 %v30_v47 }
  0xf6   :  { %v113_v52 = vpop.f32.mrb[0].mxu0 }
  0xf7   :  { %v130_v53 = vadd.f32 %v255_v51, %v113_v52  ;;  %v325_v54 = vpop.f32.mrb[1].mxu0 }
  0xf9   :  { %v131_v55 = vmax.f32 %v130_v53, 0.0 }
  0xfb   :  { %132 = vst [vmem:[#allocation5] sm:$0xff] %v131_v55  ;;  %359 = vmatmul.mubr.f32.vlgmr.msra.gmra.mrb[0].mxu1 %v131_v55 }
  0xfc   :  { %425 = shalt.err (!%p422_p4)
}
  0xfd   :  { %s426_s2 = scalar_lea.hbm %s653_s6, 128 }
  0xfe   :  { %p427_p5 = scmp.ne.s32.totalorder %s653_s6, %s426_s2  ;;  %p430_p6 = scmp.lt.u32.totalorder %s426_s2, %s653_s6 }
 0x100   :  { %p432_p7 = pnand %p430_p6, %p427_p5 }
 0x102   :  { %435 = shalt.err (!%p432_p7)
}
 0x103   :  { %246 = dma.vmem_to_hbm [thread:$0]  %s244_s16, 128, %s653_s6, [#allocation6]   ;;  %v256_v56 = vld [vmem:[%s651_s4] ss:$0 sm:$0xff] }
 0x104   :  { %s466_s27 = smov [#allocation3]  }
 0x105   :  { %s233_s28 = sshll.u32 %s466_s27, 4  ;;  %s234_s28 = int_to_ptr.vmem [resolvable:$true] %s233_s28 }
 0x106   :  { %s436_s29 = scalar_lea.vmem %s234_s28, 128  ;;  %p441_p9 = scmp.lt.s32.totalorder %s234_s28, %s234_s28 }
 0x107   :  { %p437_p8 = scmp.ne.s32.totalorder %s234_s28, %s436_s29  ;;  %p442_p10 = scmp.lt.s32.totalorder %s436_s29, %s436_s29 }
 0x109   :  { %p443_p11 = por %p442_p10, %p441_p9 }
 0x10b   :  { %p444_p12 = pnand %p443_p11, %p437_p8 }
 0x1ce   :  { %v222_v57 = vpop.f32.mrb[0].mxu1 }
 0x1cf   :  { %v223_v58 = vadd.f32 %v256_v56, %v222_v57  ;;  %v360_v59 = vpop.f32.mrb[1].mxu1 }
 0x1d1   :  { %226 = vst [vmem:[#allocation3] sm:$0xff] %v223_v58 }
 0x1d2   :  { %447 = shalt.err (!%p444_p12)
}
 0x1d3   :  { %s448_s7 = scalar_lea.hbm %s652_s5, 128 }
 0x1d4   :  { %p449_p13 = scmp.ne.s32.totalorder %s652_s5, %s448_s7  ;;  %p452_p0 = scmp.lt.u32.totalorder %s448_s7, %s652_s5 }
 0x1d6   :  { %p454_p1 = pnand %p452_p0, %p449_p13 }
 0x1d8   :  { %457 = shalt.err (!%p454_p1)
}
 0x1d9   :  { %236 = dma.vmem_to_hbm [thread:$0]  %s234_s28, 128, %s652_s5, [#allocation4]  }
 0x1da   :  { %458 = dma.done.wait [#allocation4], 128  }
 0x1db   :  { %459 = vsyncadd [#allocation4], 4294967168 }
 0x1dc   :  { %460 = dma.done.wait [#allocation6], 128  }
 0x1dd   :  { %461 = vsyncadd [#allocation6], 4294967168 }
 0x1de   :  { %253 = vsyncpa [#allocation4], 1 }
 0x1df   :  { %254 = vsyncpa [#allocation6], 1 }

</bundles_post_ra>
